<compile_context>
chip_gen: v7x
topology: tpu7x:2x2x1
jax: 0.10.0
libtpu: 0.0.40
codegen_flags: <defaults>
</compile_context>

<pallas_src>
import functools

import jax
import jax.numpy as jnp
from jax.experimental import pallas as pl
from jax.experimental.pallas import tpu as pltpu


def _inverted_residual_kernel(x_ref, w1_ref, wdw_ref, w2_ref, o_ref, *, H, W):
    # x_ref:   (1, Nb*Cin,  H*W)      one block of Nb images, channels on sublanes
    # w1_ref:  (Nb*Hd, Nb*Cin)        block-diagonal expand 1x1 weights
    # wdw_ref: (Nb*Hd, 9)             depthwise 3x3 taps, row-major k = ki*3 + kj
    # w2_ref:  (Nb*Cout, Nb*Hd)       block-diagonal project 1x1 weights
    # o_ref:   (1, Nb*Cout, H*W)      lane-dense output (already NCHW after reshape)
    HW = H * W

    x = x_ref[0]            # (Nb*Cin, HW)
    w1 = w1_ref[...]
    wdw = wdw_ref[...]
    w2 = w2_ref[...]

    # ---- 1x1 expand conv + ReLU6 on the MXU: (Nb*Hd, Nb*Cin) @ (Nb*Cin, HW)
    h1 = jnp.dot(w1, x, preferred_element_type=jnp.float32)
    h1 = jnp.clip(h1, 0.0, 6.0)

    # ---- ReflectionPad2d(1) boundary masks in flattened-spatial layout.
    # Computed once at (1, HW) and broadcast in jnp.where (saves VALU + vregs).
    idx = jax.lax.broadcasted_iota(jnp.int32, (1, HW), 1)
    if (W & (W - 1)) == 0:          # W is a power of two -> cheap bitwise AND
        col = idx & (W - 1)
    else:
        col = idx % W
    col_first = col == 0
    col_last = col == (W - 1)
    row_first = idx < W
    row_last = idx >= (HW - W)

    # pltpu.roll wraps around the flattened axis; wrapped positions are exactly
    # the reflection positions, and the reflected value is what the *opposite*
    # roll produced there, so the masks overwrite every contaminated lane.
    def hshift(a):
        r_p = pltpu.roll(a, shift=HW - 1, axis=1)   # value at flat index i+1
        r_m = pltpu.roll(a, shift=1, axis=1)        # value at flat index i-1
        return {
            -1: jnp.where(col_first, r_p, r_m),     # dj=-1: reflect w=0   -> 1
            0: a,
            1: jnp.where(col_last, r_m, r_p),       # dj=+1: reflect w=W-1 -> W-2
        }

    def vshift(a):
        r_p = pltpu.roll(a, shift=HW - W, axis=1)   # value at flat index i+W
        r_m = pltpu.roll(a, shift=W, axis=1)        # value at flat index i-W
        return {
            -1: jnp.where(row_first, r_p, r_m),     # di=-1: reflect h=0   -> 1
            0: a,
            1: jnp.where(row_last, r_m, r_p),       # di=+1: reflect h=H-1 -> H-2
        }

    # ---- depthwise 3x3 conv: 8 XLU rolls + 9 lane-broadcast FMAs, then ReLU6.
    h_sh = hshift(h1)
    acc = wdw[:, 4:5] * h1                          # centre tap (di=0, dj=0) seeds acc
    for dj in (-1, 0, 1):                           # static, fully unrolled 9-tap loop
        v_sh = vshift(h_sh[dj])
        for di in (-1, 0, 1):
            if di == 0 and dj == 0:
                continue
            k = (di + 1) * 3 + (dj + 1)
            acc = acc + wdw[:, k:k + 1] * v_sh[di]  # (M,1) lane-broadcast FMA
    h2 = jnp.clip(acc, 0.0, 6.0)

    # ---- 1x1 project conv on the MXU: (Nb*Cout, Nb*Hd) @ (Nb*Hd, HW)
    out = jnp.dot(w2, h2, preferred_element_type=jnp.float32)
    o_ref[0] = out.astype(o_ref.dtype)


def _default_num_blocks(N):
    """1 grid step on single-TC chips (v5e/v6e); 2 CORE_PARALLEL steps on v7x."""
    try:
        kind = jax.devices()[0].device_kind.lower()
    except Exception:  # pragma: no cover - defensive
        kind = ""
    blocks = 2 if ("v7" in kind and N % 2 == 0 and N >= 2) else 1
    # Keep images-per-block modest so block-diag weights / live vregs stay small.
    while N // blocks > 8 and N % (blocks * 2) == 0:
        blocks *= 2
    return blocks


def inverted_residual_block(x_nchw, conv1_w, dw_w, conv2_w, *, num_blocks=None):
    """Forward pass equivalent to the PyTorch InvertedResidualBlock.

    x_nchw : (N, Cin, H, W)    float32
    conv1_w: (Hd, Cin, 1, 1)   PyTorch layout, bias-free
    dw_w   : (Hd, 1, 3, 3)     PyTorch depthwise layout, bias-free
    conv2_w: (Cout, Hd, 1, 1)  PyTorch layout, bias-free
    returns: (N, Cout, H, W)   float32
    """
    N, Cin, H, W = x_nchw.shape
    Hd = conv1_w.shape[0]
    Cout = conv2_w.shape[0]
    HW = H * W
    assert H >= 2 and W >= 2, "ReflectionPad2d(1) requires H >= 2 and W >= 2"

    if num_blocks is None:
        num_blocks = _default_num_blocks(N)
    if N % num_blocks != 0:
        num_blocks = 1
    Nb = N // num_blocks

    # Free, contiguous reshapes only -- no HBM transpose round-trips.
    x = x_nchw.reshape(num_blocks, Nb * Cin, HW)

    w1 = conv1_w[:, :, 0, 0]                       # (Hd, Cin)
    w2 = conv2_w[:, :, 0, 0]                       # (Cout, Hd)
    wdw = dw_w[:, 0, :, :].reshape(Hd, 9)          # (Hd, 9)

    eye = jnp.eye(Nb, dtype=x_nchw.dtype)
    w1_bd = jnp.kron(eye, w1)                      # (Nb*Hd, Nb*Cin) block-diagonal
    w2_bd = jnp.kron(eye, w2)                      # (Nb*Cout, Nb*Hd) block-diagonal
    wdw_t = jnp.tile(wdw, (Nb, 1))                 # (Nb*Hd, 9)

    kernel = functools.partial(_inverted_residual_kernel, H=H, W=W)

    if num_blocks == 1:
        dim_sems = ("arbitrary",)
    else:
        # Genuine 2-TensorCore sharding on v7x needs CORE_PARALLEL semantics.
        dim_sems = (getattr(pltpu, "CORE_PARALLEL", "parallel"),)

    out = pl.pallas_call(
        kernel,
        out_shape=jax.ShapeDtypeStruct((num_blocks, Nb * Cout, HW), x_nchw.dtype),
        grid_spec=pltpu.PrefetchScalarGridSpec(
            num_scalar_prefetch=0,
            grid=(num_blocks,),
            in_specs=[
                pl.BlockSpec((1, Nb * Cin, HW), lambda b: (b, 0, 0)),
                pl.BlockSpec((Nb * Hd, Nb * Cin), lambda b: (0, 0)),
                pl.BlockSpec((Nb * Hd, 9), lambda b: (0, 0)),
                pl.BlockSpec((Nb * Cout, Nb * Hd), lambda b: (0, 0)),
            ],
            out_specs=pl.BlockSpec((1, Nb * Cout, HW), lambda b: (b, 0, 0)),
        ),
        compiler_params=pltpu.CompilerParams(dimension_semantics=dim_sems),
    )(x, w1_bd, wdw_t, w2_bd)

    # (num_blocks, Nb*Cout, HW) is contiguously (N*Cout, HW): reshape is free.
    return out.reshape(N, Cout, H, W)


def _reference(x_nchw, conv1_w, dw_w, conv2_w):
    """Pure-JAX reference mirroring the PyTorch module semantics."""
    N, Cin, H, W = x_nchw.shape
    Hd = conv1_w.shape[0]
    x = jnp.transpose(x_nchw, (0, 2, 3, 1))
    w1 = jnp.transpose(conv1_w[:, :, 0, 0], (1, 0))
    wdw = jnp.transpose(dw_w[:, 0, :, :], (1, 2, 0))
    w2 = jnp.transpose(conv2_w[:, :, 0, 0], (1, 0))

    h1 = jnp.clip(jnp.einsum("nhwc,cd->nhwd", x, w1), 0.0, 6.0)
    hp = jnp.pad(h1, ((0, 0), (1, 1), (1, 1), (0, 0)), mode="reflect")
    acc = jnp.zeros((N, H, W, Hd), jnp.float32)
    for di in range(3):
        for dj in range(3):
            acc = acc + hp[:, di:di + H, dj:dj + W, :] * wdw[di, dj]
    h2 = jnp.clip(acc, 0.0, 6.0)
    out = jnp.einsum("nhwd,do->nhwo", h2, w2)
    return jnp.transpose(out, (0, 3, 1, 2))


if __name__ == "__main__":
    # Module config: inp=4, oup=4, expand_ratio=2 -> hidden_dim=8
    N, Cin, H, W = 2, 4, 16, 16
    expand_ratio = 2
    Hd = int(Cin * expand_ratio)
    Cout = 4

    key = jax.random.PRNGKey(0)
    kx, k1, k2, k3 = jax.random.split(key, 4)
    x = jax.random.normal(kx, (N, Cin, H, W), dtype=jnp.float32)
    conv1_w = 0.1 * jax.random.normal(k1, (Hd, Cin, 1, 1), dtype=jnp.float32)
    dw_w = 0.1 * jax.random.normal(k2, (Hd, 1, 3, 3), dtype=jnp.float32)
    conv2_w = 0.1 * jax.random.normal(k3, (Cout, Hd, 1, 1), dtype=jnp.float32)

    out = jax.block_until_ready(inverted_residual_block(x, conv1_w, dw_w, conv2_w))
    ref = jax.block_until_ready(_reference(x, conv1_w, dw_w, conv2_w))

    assert out.shape == (N, Cout, H, W), out.shape
    assert jnp.allclose(out, ref, rtol=1e-5, atol=1e-5), float(
        jnp.max(jnp.abs(out - ref))
    )
    print("KERNEL_OK")
</pallas_src>

<mosaic_0001>
module attributes {stable_mosaic.version = 11 : i64} {
  func.func @_inverted_residual_kernel(%arg0: i32, %arg1: memref<1x8x256xf32, #tpu.memory_space<vmem>>, %arg2: memref<16x8xf32, #tpu.memory_space<vmem>>, %arg3: memref<16x9xf32, #tpu.memory_space<vmem>>, %arg4: memref<8x16xf32, #tpu.memory_space<vmem>>, %arg5: memref<1x8x256xf32, #tpu.memory_space<vmem>>) attributes {dimension_semantics = [#tpu.dimension_semantics<arbitrary>], iteration_bounds = array<i64: 1>, scalar_prefetch = 0 : i64, scratch_operands = 0 : i64, tpu.core_type = #tpu.core_type<tc>, window_params = [{transform_indices = @transform_0, window_bounds = array<i64: 1, 8, 256>}, {pipeline_mode = #tpu.pipeline_mode<synchronous>, transform_indices = @transform_1, window_bounds = array<i64: 16, 8>}, {pipeline_mode = #tpu.pipeline_mode<synchronous>, transform_indices = @transform_2, window_bounds = array<i64: 16, 9>}, {pipeline_mode = #tpu.pipeline_mode<synchronous>, transform_indices = @transform_3, window_bounds = array<i64: 8, 16>}, {transform_indices = @transform_4, window_bounds = array<i64: 1, 8, 256>}]} {
    %c0 = arith.constant 0 : index
    %c0_0 = arith.constant 0 : index
    %c0_1 = arith.constant 0 : index
    %0 = vector.load %arg1[%c0, %c0_0, %c0_1] : memref<1x8x256xf32, #tpu.memory_space<vmem>>, vector<1x8x256xf32>
    %1 = vector.shape_cast %0 : vector<1x8x256xf32> to vector<8x256xf32>
    %c0_2 = arith.constant 0 : index
    %c0_3 = arith.constant 0 : index
    %2 = vector.load %arg2[%c0_2, %c0_3] : memref<16x8xf32, #tpu.memory_space<vmem>>, vector<16x8xf32>
    %c0_4 = arith.constant 0 : index
    %c0_5 = arith.constant 0 : index
    %3 = vector.load %arg3[%c0_4, %c0_5] : memref<16x9xf32, #tpu.memory_space<vmem>>, vector<16x9xf32>
    %c0_6 = arith.constant 0 : index
    %c0_7 = arith.constant 0 : index
    %4 = vector.load %arg4[%c0_6, %c0_7] : memref<8x16xf32, #tpu.memory_space<vmem>>, vector<8x16xf32>
    %cst = arith.constant dense<0.000000e+00> : vector<16x256xf32>
    %5 = tpu.matmul %2, %1, %cst {dimension_numbers = #tpu.dot_dimension_numbers<[1], [0], [0], [1], [0, 0, 1, 1], [], []>} : vector<16x8xf32>, vector<8x256xf32>, vector<16x256xf32> -> vector<16x256xf32>
    %cst_8 = arith.constant 0.000000e+00 : f32
    %cst_9 = arith.constant 6.000000e+00 : f32
    %6 = vector.broadcast %cst_8 : f32 to vector<16x256xf32>
    %7 = arith.maximumf %6, %5 : vector<16x256xf32>
    %8 = vector.broadcast %cst_9 : f32 to vector<16x256xf32>
    %9 = arith.minimumf %8, %7 : vector<16x256xf32>
    %10 = tpu.iota {dimensions = array<i32: 1>} : vector<1x256xi32>
    %c15_i32 = arith.constant 15 : i32
    %11 = vector.broadcast %c15_i32 : i32 to vector<1x256xi32>
    %12 = arith.andi %10, %11 : vector<1x256xi32>
    %c0_i32 = arith.constant 0 : i32
    %13 = vector.broadcast %c0_i32 : i32 to vector<1x256xi32>
    %14 = arith.cmpi eq, %12, %13 : vector<1x256xi32>
    %c15_i32_10 = arith.constant 15 : i32
    %15 = vector.broadcast %c15_i32_10 : i32 to vector<1x256xi32>
    %16 = arith.cmpi eq, %12, %15 : vector<1x256xi32>
    %c16_i32 = arith.constant 16 : i32
    %17 = vector.broadcast %c16_i32 : i32 to vector<1x256xi32>
    %18 = arith.cmpi slt, %10, %17 : vector<1x256xi32>
    %c240_i32 = arith.constant 240 : i32
    %19 = vector.broadcast %c240_i32 : i32 to vector<1x256xi32>
    %20 = arith.cmpi sge, %10, %19 : vector<1x256xi32>
    %c255_i32 = arith.constant 255 : i32
    %21 = tpu.dynamic_rotate %9 by %c255_i32 dim 1 : vector<16x256xf32>, i32 -> vector<16x256xf32>
    %c1_i32 = arith.constant 1 : i32
    %22 = tpu.dynamic_rotate %9 by %c1_i32 dim 1 : vector<16x256xf32>, i32 -> vector<16x256xf32>
    %23 = vector.shape_cast %14 : vector<1x256xi1> to vector<1x256xi1>
    %24 = vector.broadcast %23 : vector<1x256xi1> to vector<16x256xi1>
    %25 = arith.select %24, %21, %22 : vector<16x256xi1>, vector<16x256xf32>
    %26 = vector.shape_cast %16 : vector<1x256xi1> to vector<1x256xi1>
    %27 = vector.broadcast %26 : vector<1x256xi1> to vector<16x256xi1>
    %28 = arith.select %27, %22, %21 : vector<16x256xi1>, vector<16x256xf32>
    %29 = vector.extract_strided_slice %3 {offsets = [0, 4], sizes = [16, 1], strides = [1, 1]} : vector<16x9xf32> to vector<16x1xf32>
    %30 = vector.broadcast %29 : vector<16x1xf32> to vector<16x256xf32>
    %31 = arith.mulf %30, %9 : vector<16x256xf32>
    %c240_i32_11 = arith.constant 240 : i32
    %32 = tpu.dynamic_rotate %25 by %c240_i32_11 dim 1 : vector<16x256xf32>, i32 -> vector<16x256xf32>
    %c16_i32_12 = arith.constant 16 : i32
    %33 = tpu.dynamic_rotate %25 by %c16_i32_12 dim 1 : vector<16x256xf32>, i32 -> vector<16x256xf32>
    %34 = vector.shape_cast %18 : vector<1x256xi1> to vector<1x256xi1>
    %35 = vector.broadcast %34 : vector<1x256xi1> to vector<16x256xi1>
    %36 = arith.select %35, %32, %33 : vector<16x256xi1>, vector<16x256xf32>
    %37 = vector.shape_cast %20 : vector<1x256xi1> to vector<1x256xi1>
    %38 = vector.broadcast %37 : vector<1x256xi1> to vector<16x256xi1>
    %39 = arith.select %38, %33, %32 : vector<16x256xi1>, vector<16x256xf32>
    %40 = vector.extract_strided_slice %3 {offsets = [0, 0], sizes = [16, 1], strides = [1, 1]} : vector<16x9xf32> to vector<16x1xf32>
    %41 = vector.broadcast %40 : vector<16x1xf32> to vector<16x256xf32>
    %42 = arith.mulf %41, %36 : vector<16x256xf32>
    %43 = arith.addf %31, %42 : vector<16x256xf32>
    %44 = vector.extract_strided_slice %3 {offsets = [0, 3], sizes = [16, 1], strides = [1, 1]} : vector<16x9xf32> to vector<16x1xf32>
    %45 = vector.broadcast %44 : vector<16x1xf32> to vector<16x256xf32>
    %46 = arith.mulf %45, %25 : vector<16x256xf32>
    %47 = arith.addf %43, %46 : vector<16x256xf32>
    %48 = vector.extract_strided_slice %3 {offsets = [0, 6], sizes = [16, 1], strides = [1, 1]} : vector<16x9xf32> to vector<16x1xf32>
    %49 = vector.broadcast %48 : vector<16x1xf32> to vector<16x256xf32>
    %50 = arith.mulf %49, %39 : vector<16x256xf32>
    %51 = arith.addf %47, %50 : vector<16x256xf32>
    %c240_i32_13 = arith.constant 240 : i32
    %52 = tpu.dynamic_rotate %9 by %c240_i32_13 dim 1 : vector<16x256xf32>, i32 -> vector<16x256xf32>
    %c16_i32_14 = arith.constant 16 : i32
    %53 = tpu.dynamic_rotate %9 by %c16_i32_14 dim 1 : vector<16x256xf32>, i32 -> vector<16x256xf32>
    %54 = vector.shape_cast %18 : vector<1x256xi1> to vector<1x256xi1>
    %55 = vector.broadcast %54 : vector<1x256xi1> to vector<16x256xi1>
    %56 = arith.select %55, %52, %53 : vector<16x256xi1>, vector<16x256xf32>
    %57 = vector.shape_cast %20 : vector<1x256xi1> to vector<1x256xi1>
    %58 = vector.broadcast %57 : vector<1x256xi1> to vector<16x256xi1>
    %59 = arith.select %58, %53, %52 : vector<16x256xi1>, vector<16x256xf32>
    %60 = vector.extract_strided_slice %3 {offsets = [0, 1], sizes = [16, 1], strides = [1, 1]} : vector<16x9xf32> to vector<16x1xf32>
    %61 = vector.broadcast %60 : vector<16x1xf32> to vector<16x256xf32>
    %62 = arith.mulf %61, %56 : vector<16x256xf32>
    %63 = arith.addf %51, %62 : vector<16x256xf32>
    %64 = vector.extract_strided_slice %3 {offsets = [0, 7], sizes = [16, 1], strides = [1, 1]} : vector<16x9xf32> to vector<16x1xf32>
    %65 = vector.broadcast %64 : vector<16x1xf32> to vector<16x256xf32>
    %66 = arith.mulf %65, %59 : vector<16x256xf32>
    %67 = arith.addf %63, %66 : vector<16x256xf32>
    %c240_i32_15 = arith.constant 240 : i32
    %68 = tpu.dynamic_rotate %28 by %c240_i32_15 dim 1 : vector<16x256xf32>, i32 -> vector<16x256xf32>
    %c16_i32_16 = arith.constant 16 : i32
    %69 = tpu.dynamic_rotate %28 by %c16_i32_16 dim 1 : vector<16x256xf32>, i32 -> vector<16x256xf32>
    %70 = vector.shape_cast %18 : vector<1x256xi1> to vector<1x256xi1>
    %71 = vector.broadcast %70 : vector<1x256xi1> to vector<16x256xi1>
    %72 = arith.select %71, %68, %69 : vector<16x256xi1>, vector<16x256xf32>
    %73 = vector.shape_cast %20 : vector<1x256xi1> to vector<1x256xi1>
    %74 = vector.broadcast %73 : vector<1x256xi1> to vector<16x256xi1>
    %75 = arith.select %74, %69, %68 : vector<16x256xi1>, vector<16x256xf32>
    %76 = vector.extract_strided_slice %3 {offsets = [0, 2], sizes = [16, 1], strides = [1, 1]} : vector<16x9xf32> to vector<16x1xf32>
    %77 = vector.broadcast %76 : vector<16x1xf32> to vector<16x256xf32>
    %78 = arith.mulf %77, %72 : vector<16x256xf32>
    %79 = arith.addf %67, %78 : vector<16x256xf32>
    %80 = vector.extract_strided_slice %3 {offsets = [0, 5], sizes = [16, 1], strides = [1, 1]} : vector<16x9xf32> to vector<16x1xf32>
    %81 = vector.broadcast %80 : vector<16x1xf32> to vector<16x256xf32>
    %82 = arith.mulf %81, %28 : vector<16x256xf32>
    %83 = arith.addf %79, %82 : vector<16x256xf32>
    %84 = vector.extract_strided_slice %3 {offsets = [0, 8], sizes = [16, 1], strides = [1, 1]} : vector<16x9xf32> to vector<16x1xf32>
    %85 = vector.broadcast %84 : vector<16x1xf32> to vector<16x256xf32>
    %86 = arith.mulf %85, %75 : vector<16x256xf32>
    %87 = arith.addf %83, %86 : vector<16x256xf32>
    %cst_17 = arith.constant 0.000000e+00 : f32
    %cst_18 = arith.constant 6.000000e+00 : f32
    %88 = vector.broadcast %cst_17 : f32 to vector<16x256xf32>
    %89 = arith.maximumf %88, %87 : vector<16x256xf32>
    %90 = vector.broadcast %cst_18 : f32 to vector<16x256xf32>
    %91 = arith.minimumf %90, %89 : vector<16x256xf32>
    %cst_19 = arith.constant dense<0.000000e+00> : vector<8x256xf32>
    %92 = tpu.matmul %4, %91, %cst_19 {dimension_numbers = #tpu.dot_dimension_numbers<[1], [0], [0], [1], [0, 0, 1, 1], [], []>} : vector<8x16xf32>, vector<16x256xf32>, vector<8x256xf32> -> vector<8x256xf32>
    %c0_20 = arith.constant 0 : index
    %c0_21 = arith.constant 0 : index
    %c0_22 = arith.constant 0 : index
    %93 = vector.load %arg5[%c0_20, %c0_21, %c0_22] : memref<1x8x256xf32, #tpu.memory_space<vmem>>, vector<1x8x256xf32>
    %94 = vector.shape_cast %93 : vector<1x8x256xf32> to vector<8x256xf32>
    %95 = vector.shape_cast %92 : vector<8x256xf32> to vector<1x8x256xf32>
    tpu.vector_store %arg5[%c0_20, %c0_21, %c0_22], %95 {strides = array<i32>} : memref<1x8x256xf32, #tpu.memory_space<vmem>>, vector<1x8x256xf32>,
    return
  }
  func.func @transform_0(%arg0: i32) -> (i32, i32, i32) {
    %c0_i32 = arith.constant 0 : i32
    %c0_i32_0 = arith.constant 0 : i32
    %c0_i32_1 = arith.constant 0 : i32
    return %arg0, %c0_i32, %c0_i32_0 : i32, i32, i32
  }
  func.func @transform_1(%arg0: i32) -> (i32, i32) {
    %c0_i32 = arith.constant 0 : i32
    %c0_i32_0 = arith.constant 0 : i32
    %c0_i32_1 = arith.constant 0 : i32
    return %c0_i32, %c0_i32_0 : i32, i32
  }
  func.func @transform_2(%arg0: i32) -> (i32, i32) {
    %c0_i32 = arith.constant 0 : i32
    %c0_i32_0 = arith.constant 0 : i32
    %c0_i32_1 = arith.constant 0 : i32
    return %c0_i32, %c0_i32_0 : i32, i32
  }
  func.func @transform_3(%arg0: i32) -> (i32, i32) {
    %c0_i32 = arith.constant 0 : i32
    %c0_i32_0 = arith.constant 0 : i32
    %c0_i32_1 = arith.constant 0 : i32
    return %c0_i32, %c0_i32_0 : i32, i32
  }
  func.func @transform_4(%arg0: i32) -> (i32, i32, i32) {
    %c0_i32 = arith.constant 0 : i32
    %c0_i32_0 = arith.constant 0 : i32
    %c0_i32_1 = arith.constant 0 : i32
    return %arg0, %c0_i32, %c0_i32_0 : i32, i32, i32
  }
}

</mosaic_0001>

<bundles_post_ra>
// kernel: tpu_custom_call.1
= control target key start
LH: loop header
LB: loop body
LE: loop exit
PB: predicated region body
PF: predicated region fallthrough
CT: control target
= control target key end

     0   :  { %9 = vsyncpa [#allocation3], 0  ;;  %s1026_s0 = inlined_call_operand.vmem [shape: f32[1,8,256], index: 0, kind: input, shape index: {}]   ;;  %s1027_s1 = inlined_call_operand.vmem [shape: f32[16,8], index: 1, kind: input, shape index: {}]   ;;  %s1028_s2 = inlined_call_operand.hbm [shape: f32[16,9], index: 2, kind: input, shape index: {}]   ;;  %s1029_s3 = inlined_call_operand.vmem [shape: f32[8,16], index: 3, kind: input, shape index: {}]   ;;  %s1030_s4 = inlined_call_operand.hbm [shape: f32[1,8,256], index: 4, kind: output, shape index: {}]  }
   0x1   :  { %10 = vsyncpa [#allocation4], 0  ;;  %s622_s15 = smov [#allocation2]   ;;  %s574_s19 = scalar_lea.hbm %s1028_s2, 256 }
   0x2   :  { %s20_s16 = sshll.u32 %s622_s15, 4  ;;  %p575_p0 = scmp.ne.s32.totalorder %s1028_s2, %s574_s19  ;;  %s21_s16 = int_to_ptr.vmem [resolvable:$true] %s20_s16 }
   0x3   :  { %p578_p1 = scmp.lt.u32.totalorder %s574_s19, %s1028_s2 }
   0x5   :  { %p580_p2 = pnand %p578_p1, %p575_p0 }
   0x7   :  { %583 = shalt.err (!%p580_p2)
}
   0x8   :  { %s584_s24 = scalar_lea.vmem %s21_s16, 256  ;;  %p589_p4 = scmp.lt.s32.totalorder %s21_s16, %s21_s16 }
   0x9   :  { %p585_p3 = scmp.ne.s32.totalorder %s21_s16, %s584_s24  ;;  %p590_p5 = scmp.lt.s32.totalorder %s584_s24, %s584_s24 }
   0xb   :  { %p591_p6 = por %p590_p5, %p589_p4 }
   0xd   :  { %p592_p7 = pnand %p591_p6, %p585_p3 }
   0xf   :  { %595 = shalt.err (!%p592_p7)
}
  0x10   :  { %s623_s25 = smov 128   ;;  %s624_s26 = smov 8  }
  0x11   :  { %26 = dma.hbm_to_vmem [thread:$0]  %s1028_s2, 256, %s21_s16, [#allocation3], %s623_s25, %s623_s25, %s624_s26  }
  0x12   :  { %618 = dma.done.wait [#allocation3], 256  }
  0x13   :  { %619 = vsyncadd [#allocation3], 4294967040  ;;  %v625_v0 = vmov 0.0   ;;  %v626_v1 = vmov 4   ;;  %v33_v2 = vld [vmem:[%s1026_s0 + $0x8] sm:$0xff]  ;;  %v32_v3 = vld [vmem:[%s1026_s0] sm:$0xff]  ;;  %v131_v37 = vlaneseq }
  0x14   :  { %110 = vmatprep.mubr.f32.mxu0 %v625_v0  ;;  %558 = vset.pattern.permute.xlu0 %v626_v1  ;;  %v34_v4 = vld [vmem:[%s1027_s1] sm:$0xff]  ;;  %vm39_vm0 = vcmask 64512   ;;  %v688_v6 = vld [vmem:[#allocation2 + $0x8] sm:$0xff]  ;;  %v627_v8 = vmov 0   ;;  %v628_v9 = vmov 3   ;;  %v629_v10 = vmov 6  }
  0x15   :  { %559 = vset.pattern.permute.xlu1 %v626_v1  ;;  %509 = vmatprep.mubr.f32.mxu1 %v625_v0  ;;  %v686_v5 = vld [vmem:[#allocation2] sm:$0xff]  ;;  %v35_v7 = vld [vmem:[%s1027_s1 + $0x8] sm:$0xff]  ;;  %v630_v11 = vmov 1   ;;  %v631_v12 = vmov 7   ;;  %s632_s0 = smov 127   ;;  %s633_s1 = smov 1  }
  0x16   :  { %46 = vmatprep.subr.mxu0 %v33_v2  ;;  %188 = vperm.xlu0 %558, %v686_v5   ;;  %v634_v25 = vmov 2   ;;  %s635_s10 = smov 112   ;;  %v636_v26 = vmov 5   ;;  %s637_s11 = smov 16   ;;  %v638_v27 = vmov 8   ;;  %v761_v39 = vand.u32 127, %v131_v37 }
  0x17   :  { %47 = vmatpush1.msra.mxu0 %v32_v3  ;;  %193 = vperm.xlu1 %559, %v688_v6   ;;  %vm441_vm10 = vcmask 130048   ;;  %s639_s14 = smov [#allocation5]  }
  0x18   :  { %533 = vmatmul.mubr.msk.f32.vlgmr.msra.gmra.mrb[0].mxu0 %vm39_vm0, %v34_v4  ;;  %v134_v41 = vand.u32 15, %v761_v39  ;;  %v765_v42 = vadd.s32 128, %v761_v39  ;;  %vm152_vm1 = vcmp.lt.s32.totalorder %v761_v39, 127  ;;  %vm165_vm2 = vcmp.lt.s32.totalorder %v761_v39, 1  ;;  %s524_s15 = sshll.u32 %s639_s14, 4  ;;  %s525_s15 = int_to_ptr.vmem [resolvable:$true] %s524_s15 }
  0x19   :  { %116 = vmatprep.mubr.f32.mxu0 %v625_v0  ;;  %vm208_vm7 = vcmp.lt.s32.totalorder %v761_v39, 112  ;;  %vm140_vm8 = vcmp.lt.s32.totalorder %v761_v39, 16  ;;  %s596_s16 = scalar_lea.vmem %s525_s15, 256  ;;  %p601_p9 = scmp.lt.s32.totalorder %s525_s15, %s525_s15 }
  0x1a   :  { %561 = vset.pattern.permute.xlu0 %v627_v8  ;;  %vm769_vm3 = vcmp.eq.s32.totalorder %v134_v41, 15  ;;  %vm773_vm4 = vcmp.eq.s32.totalorder %v134_v41, 0  ;;  %v135_v47 = vand.u32 15, %v765_v42  ;;  %vm143_vm9 = vcmp.ge.s32.totalorder %v765_v42, 240  ;;  %p597_p8 = scmp.ne.s32.totalorder %s525_s15, %s596_s16  ;;  %p602_p10 = scmp.lt.s32.totalorder %s596_s16, %s596_s16 }
  0x1b   :  { %560 = vset.pattern.permute.xlu1 %v627_v8  ;;  %246 = vperm.xlu0 %561, %v688_v6  }
  0x1c   :  { %534 = vmatmul.mubr.msk.f32.gmra.mrb[2].mxu0 %vm39_vm0, %v35_v7  ;;  %242 = vperm.xlu1 %560, %v686_v5   ;;  %vm137_vm5 = vcmp.eq.s32.totalorder %v135_v47, 0  ;;  %vm139_vm6 = vcmp.eq.s32.totalorder %v135_v47, 15  ;;  %p603_p11 = por %p602_p10, %p601_p9 }
  0x1e   :  { %p604_p12 = pnand %p603_p11, %p597_p8 }
  0x1f   :  { %563 = vset.pattern.permute.xlu0 %v629_v10 }
  0x20   :  { %562 = vset.pattern.permute.xlu1 %v628_v9  ;;  %274 = vperm.xlu0 %563, %v686_v5  }
  0x21   :  { %258 = vperm.xlu1 %562, %v686_v5  }
  0x24   :  { %566 = vset.pattern.permute.xlu0 %v630_v11 }
  0x25   :  { %262 = vperm.xlu1 %562, %v688_v6  }
  0x29   :  { %564 = vset.pattern.permute.xlu1 %v629_v10 }
  0x2a   :  { %278 = vperm.xlu1 %564, %v688_v6  }
  0x2e   :  { %565 = vset.pattern.permute.xlu1 %v630_v11 }
  0x2f   :  { %322 = vperm.xlu1 %565, %v686_v5  }
  0x33   :  { %567 = vset.pattern.permute.xlu1 %v631_v12 }
  0x95   :  { %v749_v31 = vpop.permute.xlu0 %188 }
  0x96   :  { %v743_v28 = vpop.permute.xlu1 %193 }
  0x9a   :  { %v753_v33 = vpop.permute.xlu0 %246 }
  0x9b   :  { %v745_v29 = vpop.permute.xlu1 %242 }
  0x9f   :  { %v757_v35 = vpop.permute.xlu0 %274 }
  0xa0   :  { %v747_v30 = vpop.permute.xlu1 %258 }
  0xa4   :  { %v751_v32 = vpop.permute.xlu1 %262 }
  0xa9   :  { %v755_v34 = vpop.permute.xlu1 %278 }
  0xae   :  { %v759_v36 = vpop.permute.xlu1 %322 }
  0xeb   :  { %v112_v13 = vpop.f32.mrb[0].mxu0 }
  0xec   :  { %v123_v14 = vmax.f32 %v112_v13, 0.0  ;;  %v114_v15 = vpop.f32.mrb[1].mxu0 }
  0xed   :  { %v124_v16 = vmax.f32 %v114_v15, 0.0 }
  0xee   :  { %v702_v17 = vmin.f32 %v123_v14, 6.0 }
  0xef   :  { %v704_v18 = vmin.f32 %v124_v16, 6.0  ;;  %v118_v19 = vpop.f32.mrb[2].mxu0 }
  0xf0   :  { %v125_v20 = vmax.f32 %v118_v19, 0.0  ;;  %144 = vrot.lane.b32.xlu0 %v702_v17, %s632_s0  ;;  %v120_v21 = vpop.f32.mrb[3].mxu0 }
  0xf1   :  { %148 = vrot.lane.b32.xlu1 %v704_v18, %s632_s0  ;;  %v126_v23 = vmax.f32 %v120_v21, 0.0 }
  0xf2   :  { %v708_v22 = vmin.f32 %v125_v20, 6.0 }
  0xf3   :  { %v712_v24 = vmin.f32 %v126_v23, 6.0 }
  0xf4   :  { %157 = vrot.lane.b32.xlu0 %v702_v17, %s633_s1 }
  0xf5   :  { %159 = vrot.lane.b32.xlu1 %v708_v22, %s633_s1 }
  0xf8   :  { %161 = vrot.lane.b32.xlu0 %v704_v18, %s633_s1 }
  0xf9   :  { %150 = vrot.lane.b32.xlu1 %v712_v24, %s632_s0 }
  0xfc   :  { %146 = vrot.lane.b32.xlu0 %v708_v22, %s632_s0 }
  0xfd   :  { %163 = vrot.lane.b32.xlu1 %v712_v24, %s633_s1 }
 0x100   :  { %326 = vperm.xlu0 %566, %v688_v6  }
 0x101   :  { %338 = vperm.xlu1 %567, %v686_v5  }
 0x104   :  { %568 = vset.pattern.permute.xlu0 %v634_v25 }
 0x105   :  { %386 = vperm.xlu0 %568, %v686_v5   ;;  %342 = vperm.xlu1 %567, %v688_v6  }
 0x109   :  { %291 = vrot.lane.b32.xlu0 %v708_v22, %s635_s10  ;;  %569 = vset.pattern.permute.xlu1 %v634_v25 }
 0x10a   :  { %390 = vperm.xlu1 %569, %v688_v6   ;;  %571 = vset.pattern.permute.xlu0 %v636_v26 }
 0x10d   :  { %303 = vrot.lane.b32.xlu0 %v708_v22, %s637_s11 }
 0x10e   :  { %289 = vrot.lane.b32.xlu1 %v702_v17, %s635_s10 }
 0x10f   :  { %570 = vset.pattern.permute.xlu1 %v636_v26 }
 0x111   :  { %406 = vperm.xlu0 %571, %v688_v6  }
 0x112   :  { %293 = vrot.lane.b32.xlu1 %v704_v18, %s635_s10 }
 0x115   :  { %295 = vrot.lane.b32.xlu0 %v712_v24, %s635_s10 }
 0x116   :  { %301 = vrot.lane.b32.xlu1 %v702_v17, %s637_s11  ;;  %573 = vset.pattern.permute.xlu0 %v638_v27 }
 0x119   :  { %307 = vrot.lane.b32.xlu0 %v712_v24, %s637_s11 }
 0x11a   :  { %305 = vrot.lane.b32.xlu1 %v704_v18, %s637_s11 }
 0x11e   :  { %402 = vperm.xlu1 %570, %v686_v5  }
 0x122   :  { %572 = vset.pattern.permute.xlu1 %v638_v27 }
 0x123   :  { %418 = vperm.xlu1 %572, %v686_v5  }
 0x127   :  { %422 = vperm.xlu1 %572, %v688_v6  }
 0x162   :  { %v145_v38 = vpop.permute.xlu0 %144 }
 0x163   :  { %v149_v40 = vpop.permute.xlu1 %148 }
 0x164   :  { %v153_v49 = vsel %vm152_vm1, %v145_v38, %v149_v40  ;;  %v155_v56 = vsel %vm152_vm1, %v149_v40, %v145_v38 }
 0x166   :  { %v158_v43 = vpop.permute.xlu0 %157 }
 0x167   :  { %v160_v44 = vpop.permute.xlu1 %159 }
 0x16a   :  { %v162_v48 = vpop.permute.xlu0 %161 }
 0x16b   :  { %v168_v50 = vsel %vm165_vm2, %v162_v48, %v158_v43  ;;  %v151_v51 = vpop.permute.xlu1 %150  ;;  %v166_v54 = vsel %vm165_vm2, %v158_v43, %v162_v48 }
 0x16c   :  { %v784_v52 = vsel %vm769_vm3, %v168_v50, %v153_v49  ;;  %v788_v53 = vsel %vm773_vm4, %v153_v49, %v168_v50  ;;  %v802_v60 = vsel %vm137_vm5, %v155_v56, %v166_v54  ;;  %v840_v5 = vsel %vm139_vm6, %v166_v54, %v155_v56 }
 0x16d   :  { %353 = vrot.lane.b32.xlu0 %v784_v52, %s635_s10  ;;  %200 = vrot.lane.b32.xlu1 %v788_v53, %s635_s10 }
 0x16e   :  { %v147_v55 = vpop.permute.xlu0 %146 }
 0x16f   :  { %v154_v57 = vsel %vm152_vm1, %v147_v55, %v151_v51  ;;  %v164_v58 = vpop.permute.xlu1 %163  ;;  %v156_v62 = vsel %vm152_vm1, %v151_v51, %v147_v55 }
 0x170   :  { %v169_v59 = vsel %vm165_vm2, %v164_v58, %v160_v44  ;;  %v167_v63 = vsel %vm165_vm2, %v160_v44, %v164_v58 }
 0x171   :  { %204 = vrot.lane.b32.xlu1 %v802_v60, %s635_s10  ;;  %v808_v61 = vsel %vm773_vm4, %v154_v57, %v169_v59  ;;  %v818_v0 = vsel %vm137_vm5, %v156_v62, %v167_v63  ;;  %v828_v1 = vsel %vm769_vm3, %v169_v59, %v154_v57  ;;  %v836_v3 = vsel %vm139_vm6, %v167_v63, %v156_v62 }
 0x172   :  { %202 = vrot.lane.b32.xlu0 %v808_v61, %s635_s10 }
 0x175   :  { %213 = vrot.lane.b32.xlu1 %v788_v53, %s637_s11 }
 0x176   :  { %206 = vrot.lane.b32.xlu0 %v818_v0, %s635_s10 }
 0x179   :  { %217 = vrot.lane.b32.xlu1 %v802_v60, %s637_s11 }
 0x17a   :  { %215 = vrot.lane.b32.xlu0 %v808_v61, %s637_s11 }
 0x17d   :  { %355 = vrot.lane.b32.xlu1 %v828_v1, %s635_s10 }
 0x17e   :  { %219 = vrot.lane.b32.xlu0 %v818_v0, %s637_s11 }
 0x17f   :  { %v834_v2 = vpop.permute.xlu0 %326 }
 0x180   :  { %v339_v4 = vpop.permute.xlu1 %338 }
 0x181   :  { %359 = vrot.lane.b32.xlu1 %v836_v3, %s635_s10 }
 0x182   :  { %357 = vrot.lane.b32.xlu0 %v840_v5, %s635_s10 }
 0x184   :  { %v844_v6 = vpop.permute.xlu0 %386  ;;  %v846_v7 = vpop.permute.xlu1 %342 }
 0x185   :  { %367 = vrot.lane.b32.xlu1 %v828_v1, %s637_s11 }
 0x186   :  { %365 = vrot.lane.b32.xlu0 %v784_v52, %s637_s11 }
 0x188   :  { %v292_v8 = vpop.permute.xlu0 %291 }
 0x189   :  { %371 = vrot.lane.b32.xlu1 %v836_v3, %s637_s11  ;;  %v854_v9 = vpop.permute.xlu1 %390 }
 0x18a   :  { %369 = vrot.lane.b32.xlu0 %v840_v5, %s637_s11 }
 0x18c   :  { %v304_v10 = vpop.permute.xlu0 %303 }
 0x18d   :  { %v290_v11 = vpop.permute.xlu1 %289 }
 0x190   :  { %v859_v12 = vpop.permute.xlu0 %406 }
 0x191   :  { %v294_v13 = vpop.permute.xlu1 %293 }
 0x192   :  { %v297_v14 = vsel %vm208_vm7, %v290_v11, %v294_v13  ;;  %v299_v37 = vsel %vm208_vm7, %v294_v13, %v290_v11  ;;  %v197_v11 = vmul.f32 %v749_v31, %v704_v18  ;;  %v266_v18 = vmul.f32 %v747_v30, %v802_v60 }
 0x193   :  { %v863_v15 = vmul.f32 %v339_v4, %v297_v14 }
 0x194   :  { %v296_v16 = vpop.permute.xlu0 %295 }
 0x195   :  { %v867_v19 = vsel %vm208_vm7, %v292_v8, %v296_v16  ;;  %v302_v20 = vpop.permute.xlu1 %301  ;;  %v300_v25 = vsel %vm208_vm7, %v296_v16, %v292_v8 }
 0x196   :  { %v872_v21 = vmul.f32 %v846_v7, %v867_v19 }
 0x198   :  { %v308_v23 = vpop.permute.xlu0 %307 }
 0x199   :  { %v879_v26 = vsel %vm140_vm8, %v304_v10, %v308_v23  ;;  %v306_v27 = vpop.permute.xlu1 %305 }
 0x19a   :  { %v886_v38 = vsel %vm143_vm9, %v879_v26, %v300_v25  ;;  %v309_v40 = vsel %vm140_vm8, %v302_v20, %v306_v27  ;;  %v311_v41 = vsel %vm140_vm8, %v306_v27, %v302_v20  ;;  %v196_v20 = vmul.f32 %v749_v31, %v702_v17 }
 0x19b   :  { %v318_v43 = vsel %vm143_vm9, %v309_v40, %v299_v37  ;;  %v313_v44 = vsel %vm140_vm8, %v297_v14, %v311_v41  ;;  %v330_v45 = vmul.f32 %v759_v36, %v309_v40  ;;  %v199_v25 = vmul.f32 %v743_v28, %v712_v24 }
 0x19c   :  { %v897_v46 = vmul.f32 %v339_v4, %v318_v43  ;;  %v329_v47 = vmul.f32 %v759_v36, %v313_v44  ;;  %v265_v37 = vmul.f32 %v747_v30, %v788_v53  ;;  %v312_v40 = vsel %vm140_vm8, %v308_v23, %v304_v10 }
 0x19d   :  { %v900_v48 = vpop.permute.xlu1 %402 }
 0x19e   :  { %v409_v39 = vmul.f32 %v900_v48, %v784_v52 }
 0x1a2   :  { %v902_v49 = vpop.permute.xlu1 %418 }
 0x1a6   :  { %v904_v50 = vpop.permute.xlu1 %422 }
 0x1df   :  { %v906_v51 = vpop.permute.xlu0 %353  ;;  %v201_v54 = vpop.permute.xlu1 %200 }
 0x1e3   :  { %v205_v55 = vpop.permute.xlu1 %204 }
 0x1e4   :  { %v203_v56 = vpop.permute.xlu0 %202  ;;  %v209_v62 = vsel %vm208_vm7, %v201_v54, %v205_v55  ;;  %v211_v36 = vsel %vm208_vm7, %v205_v55, %v201_v54 }
 0x1e5   :  { %v281_v44 = vmul.f32 %v757_v35, %v209_v62 }
 0x1e7   :  { %v214_v57 = vpop.permute.xlu1 %213 }
 0x1e8   :  { %v207_v58 = vpop.permute.xlu0 %206 }
 0x1e9   :  { %v210_v17 = vsel %vm208_vm7, %v203_v56, %v207_v58  ;;  %v212_v24 = vsel %vm208_vm7, %v207_v58, %v203_v56 }
 0x1eb   :  { %v218_v59 = vpop.permute.xlu1 %217 }
 0x1ec   :  { %v221_v63 = vsel %vm140_vm8, %v214_v57, %v218_v59  ;;  %v223_v4 = vsel %vm140_vm8, %v218_v59, %v214_v57  ;;  %v216_v8 = vpop.permute.xlu0 %215  ;;  %v198_v57 = vmul.f32 %v743_v28, %v708_v22 }
 0x1ed   :  { %v229_v13 = vsel %vm140_vm8, %v209_v62, %v223_v4  ;;  %v238_v14 = vsel %vm143_vm9, %v221_v63, %v211_v36  ;;  %v250_v16 = vmul.f32 %v745_v29, %v221_v63  ;;  %v268_v62 = vmul.f32 %v751_v32, %v818_v0 }
 0x1ee   :  { %v249_v27 = vmul.f32 %v745_v29, %v229_v13  ;;  %v282_v53 = vmul.f32 %v757_v35, %v238_v14 }
 0x1ef   :  { %v254_v41 = vadd.f32 %v250_v16, %v197_v11  ;;  %v356_v43 = vpop.permute.xlu1 %355  ;;  %v315_v11 = vsel %vm140_vm8, %v867_v19, %v312_v40  ;;  %v283_v16 = vmul.f32 %v755_v34, %v210_v17 }
 0x1f0   :  { %v253_v29 = vadd.f32 %v249_v27, %v196_v20  ;;  %v220_v31 = vpop.permute.xlu0 %219  ;;  %v331_v19 = vmul.f32 %v834_v2, %v315_v11 }
 0x1f1   :  { %v270_v54 = vadd.f32 %v266_v18, %v254_v41  ;;  %v222_v30 = vsel %vm140_vm8, %v216_v8, %v220_v31  ;;  %v224_v60 = vsel %vm140_vm8, %v220_v31, %v216_v8  ;;  %v267_v8 = vmul.f32 %v751_v32, %v808_v61 }
 0x1f2   :  { %v269_v10 = vadd.f32 %v265_v37, %v253_v29  ;;  %v231_v23 = vsel %vm140_vm8, %v210_v17, %v224_v60  ;;  %v240_v55 = vsel %vm143_vm9, %v222_v30, %v212_v24  ;;  %v252_v56 = vmul.f32 %v753_v33, %v222_v30 }
 0x1f3   :  { %v286_v58 = vadd.f32 %v282_v53, %v270_v54  ;;  %v251_v35 = vmul.f32 %v753_v33, %v231_v23  ;;  %v360_v59 = vpop.permute.xlu1 %359  ;;  %v284_v22 = vmul.f32 %v755_v34, %v240_v55  ;;  %v412_v34 = vmul.f32 %v859_v12, %v836_v3 }
 0x1f4   :  { %v285_v36 = vadd.f32 %v281_v44, %v269_v10  ;;  %v256_v63 = vadd.f32 %v252_v56, %v199_v25  ;;  %v358_v4 = vpop.permute.xlu0 %357  ;;  %v332_v25 = vmul.f32 %v834_v2, %v879_v26  ;;  %v362_v40 = vsel %vm208_vm7, %v356_v43, %v360_v59 }
 0x1f5   :  { %v255_v13 = vadd.f32 %v251_v35, %v198_v57  ;;  %v334_v33 = vadd.f32 %v330_v45, %v286_v58  ;;  %v364_v26 = vsel %vm208_vm7, %v360_v59, %v356_v43  ;;  %v361_v2 = vsel %vm208_vm7, %v906_v51, %v358_v4 }
 0x1f6   :  { %v272_v14 = vadd.f32 %v268_v62, %v256_v63  ;;  %v333_v28 = vadd.f32 %v329_v47, %v285_v36  ;;  %v348_v47 = vmul.f32 %v846_v7, %v886_v38  ;;  %v363_v29 = vsel %vm208_vm7, %v358_v4, %v906_v51 }
 0x1f7   :  { %v271_v20 = vadd.f32 %v267_v8, %v255_v13  ;;  %v368_v0 = vpop.permute.xlu1 %367  ;;  %v350_v61 = vadd.f32 %v897_v46, %v334_v33  ;;  %v411_v51 = vmul.f32 %v859_v12, %v828_v1  ;;  %v410_v55 = vmul.f32 %v900_v48, %v840_v5 }
 0x1f8   :  { %v288_v27 = vadd.f32 %v284_v22, %v272_v14  ;;  %v366_v37 = vpop.permute.xlu0 %365  ;;  %v349_v32 = vadd.f32 %v863_v15, %v333_v28  ;;  %v427_v42 = vmul.f32 %v904_v50, %v362_v40 }
 0x1f9   :  { %v287_v18 = vadd.f32 %v283_v16, %v271_v20 }
 0x1fa   :  { %v336_v45 = vadd.f32 %v332_v25, %v288_v27 }
 0x1fb   :  { %v335_v41 = vadd.f32 %v331_v19, %v287_v18  ;;  %v372_v15 = vpop.permute.xlu1 %371 }
 0x1fc   :  { %v352_v46 = vadd.f32 %v348_v47, %v336_v45  ;;  %v374_v7 = vsel %vm140_vm8, %v368_v0, %v372_v15  ;;  %v376_v38 = vsel %vm140_vm8, %v372_v15, %v368_v0  ;;  %v370_v3 = vpop.permute.xlu0 %369 }
 0x1fd   :  { %v351_v44 = vadd.f32 %v872_v21, %v335_v41  ;;  %v379_v17 = vsel %vm140_vm8, %v362_v40, %v376_v38  ;;  %v384_v43 = vsel %vm143_vm9, %v374_v7, %v364_v26  ;;  %v396_v24 = vmul.f32 %v854_v9, %v374_v7 }
 0x1fe   :  { %v395_v31 = vmul.f32 %v854_v9, %v379_v17  ;;  %v373_v54 = vsel %vm140_vm8, %v366_v37, %v370_v3  ;;  %v375_v21 = vsel %vm140_vm8, %v370_v3, %v366_v37  ;;  %v428_v58 = vmul.f32 %v904_v50, %v384_v43 }
 0x1ff   :  { %v400_v53 = vadd.f32 %v396_v24, %v352_v46  ;;  %v377_v30 = vsel %vm140_vm8, %v361_v2, %v375_v21  ;;  %v382_v60 = vsel %vm143_vm9, %v373_v54, %v363_v29  ;;  %v394_v10 = vmul.f32 %v844_v6, %v373_v54 }
 0x200   :  { %v399_v23 = vadd.f32 %v395_v31, %v351_v44  ;;  %v393_v9 = vmul.f32 %v844_v6, %v377_v30  ;;  %v426_v1 = vmul.f32 %v902_v49, %v382_v60  ;;  %v425_v6 = vmul.f32 %v902_v49, %v361_v2  ;;  %v38_v49 = vld [vmem:[%s1029_s3] sm:$0xff] }
 0x201   :  { %v398_v56 = vadd.f32 %v394_v10, %v350_v61  ;;  %v416_v57 = vadd.f32 %v412_v34, %v400_v53 }
 0x202   :  { %v397_v35 = vadd.f32 %v393_v9, %v349_v32  ;;  %v415_v59 = vadd.f32 %v411_v51, %v399_v23 }
 0x203   :  { %v414_v62 = vadd.f32 %v410_v55, %v398_v56  ;;  %v432_v12 = vadd.f32 %v428_v58, %v416_v57 }
 0x204   :  { %v413_v36 = vadd.f32 %v409_v39, %v397_v35  ;;  %v431_v63 = vadd.f32 %v427_v42, %v415_v59 }
 0x205   :  { %v430_v5 = vadd.f32 %v426_v1, %v414_v62  ;;  %v436_v4 = vmax.f32 %v432_v12, 0.0 }
 0x206   :  { %v429_v8 = vadd.f32 %v425_v6, %v413_v36  ;;  %v435_v11 = vmax.f32 %v431_v63, 0.0 }
 0x207   :  { %v434_v13 = vmax.f32 %v430_v5, 0.0  ;;  %v440_v14 = vmin.f32 %v436_v4, 6.0 }
 0x208   :  { %v433_v22 = vmax.f32 %v429_v8, 0.0  ;;  %v439_v52 = vmin.f32 %v435_v11, 6.0 }
 0x209   :  { %v438_v48 = vmin.f32 %v434_v13, 6.0 }
 0x20a   :  { %v437_v50 = vmin.f32 %v433_v22, 6.0 }
 0x20b   :  { %v536_v28 = vpack.c.bf16 %v440_v14, %v438_v48 }
 0x20c   :  { %v538_v33 = vpack.c.bf16 %v439_v52, %v437_v50 }
 0x20d   :  { %537 = vmatprep.subr.bf16.mxu1 %v536_v28 }
 0x20e   :  { %539 = vmatpush1.bf16.msra.mxu1 %v538_v33 }
 0x211   :  { %535 = vmatmul.mubr.msk.f32.vlgmr.msra.gmra.mrb[0].mxu1 %vm441_vm10, %v38_v49 }
 0x2e4   :  { %v511_v16 = vpop.f32.mrb[0].mxu1 }
 0x2e5   :  { %516 = vst [vmem:[#allocation5] sm:$0xff] %v511_v16  ;;  %v513_v20 = vpop.f32.mrb[1].mxu1 }
 0x2e6   :  { %517 = vst [vmem:[#allocation5 + $0x8] sm:$0xff] %v513_v20 }
 0x2e7   :  { %607 = shalt.err (!%p604_p12)
}
 0x2e8   :  { %s608_s3 = scalar_lea.hbm %s1030_s4, 256 }
 0x2e9   :  { %p609_p13 = scmp.ne.s32.totalorder %s1030_s4, %s608_s3  ;;  %p612_p0 = scmp.lt.u32.totalorder %s608_s3, %s1030_s4 }
 0x2eb   :  { %p614_p1 = pnand %p612_p0, %p609_p13 }
 0x2ed   :  { %617 = shalt.err (!%p614_p1)
}
 0x2ee   :  { %527 = dma.vmem_to_hbm [thread:$0]  %s525_s15, 256, %s1030_s4, [#allocation4]  }
 0x2ef   :  { %620 = dma.done.wait [#allocation4], 256  }
 0x2f0   :  { %621 = vsyncadd [#allocation4], 4294967040 }
 0x2f1   :  { %531 = vsyncpa [#allocation3], 1 }
 0x2f2   :  { %532 = vsyncpa [#allocation4], 1 }

</bundles_post_ra>
